<compile_context>
chip_gen: v7x
topology: tpu7x:2x2x1
jax: 0.10.0
libtpu: 0.0.40
codegen_flags: <defaults>
</compile_context>

<pallas_src>
import jax
import jax.numpy as jnp
import numpy as np
from jax import lax
from jax.experimental import pallas as pl
from jax.experimental.pallas import tpu as pltpu


# --------------------------------------------------------------------------- #
# Kernel: one batch tile, everything in "features x batch_lanes" layout.
# --------------------------------------------------------------------------- #
def cnn1_kernel(x_ref,                       # [16, TB]  flattened 4x4 inputs
                m1_ref, b1_ref,              # conv1 as matrix: [25,16], [1,1]
                m2_ref, b2_ref,              # conv2 as matrix: [36,25], [1,1]
                w3_ref, b3_ref,              # Linear(36,16): [16,36], [16,1]
                w4_ref, b4_ref,              # Linear(16,16): [16,16], [16,1]
                w5_ref, b5_ref,              # Linear(16,1):  [1,16],  [1,1]
                out_ref):                    # [1, TB]
    x = x_ref[...]                                                    # [16, TB]

    # conv1 (+ bias) + ReLU  -> [25, TB]
    h = jnp.dot(m1_ref[...], x, preferred_element_type=jnp.float32) + b1_ref[...]
    h = jnp.maximum(h, 0.0)
    # conv2 (+ bias) + ReLU  -> [36, TB]   (this IS the flattened 6x6 map)
    h = jnp.dot(m2_ref[...], h, preferred_element_type=jnp.float32) + b2_ref[...]
    h = jnp.maximum(h, 0.0)
    # Linear(36,16) + ReLU
    h = jnp.dot(w3_ref[...], h, preferred_element_type=jnp.float32) + b3_ref[...]
    h = jnp.maximum(h, 0.0)
    # Linear(16,16) + ReLU
    h = jnp.dot(w4_ref[...], h, preferred_element_type=jnp.float32) + b4_ref[...]
    h = jnp.maximum(h, 0.0)
    # Linear(16,1) + sigmoid -> lane-dense [1, TB] store
    logit = jnp.dot(w5_ref[...], h, preferred_element_type=jnp.float32) + b5_ref[...]
    out_ref[...] = 1.0 / (1.0 + jnp.exp(-logit))


# --------------------------------------------------------------------------- #
# Wrapper-side weight preprocessing (done once, weights only).
# --------------------------------------------------------------------------- #
def conv2x2_as_matrix(w2x2, H, W):
    """Matrix M of shape [(H+1)*(W+1), H*W] such that, for x of shape [H,W],
    (M @ x.flatten()) equals Conv2d(1,1,kernel=2,padding=1,stride=1)(x)
    flattened row-major (bias excluded)."""
    Ho, Wo = H + 1, W + 1
    M = np.zeros((Ho * Wo, H * W), dtype=np.float32)
    w = np.asarray(w2x2, dtype=np.float32)
    for oi in range(Ho):
        for oj in range(Wo):
            for ki in range(2):
                for kj in range(2):
                    ii, jj = oi + ki - 1, oj + kj - 1
                    if 0 <= ii < H and 0 <= jj < W:
                        M[oi * Wo + oj, ii * W + jj] += w[ki, kj]
    return jnp.asarray(M)


def cnn1_forward(x, params, *, tb=128):
    """x: [B, 1, 4, 4] float32 -> [B, 1] float32."""
    (c1w, c1b, c2w, c2b, w3, b3, w4, b4, w5, b5) = params
    B = x.shape[0]
    H, W = x.shape[2], x.shape[3]

    # Convs as linear maps (weight-only reshuffle).
    m1 = conv2x2_as_matrix(c1w[0, 0], H, W)                # [25, 16]
    m2 = conv2x2_as_matrix(c2w[0, 0], H + 1, W + 1)        # [36, 25]
    b1 = jnp.full((1, 1), c1b[0], jnp.float32)
    b2 = jnp.full((1, 1), c2b[0], jnp.float32)
    b3c = b3.reshape(-1, 1).astype(jnp.float32)            # [16, 1]
    b4c = b4.reshape(-1, 1).astype(jnp.float32)            # [16, 1]
    b5c = b5.reshape(-1, 1).astype(jnp.float32)            # [1, 1]
    weights = [m1, b1, m2, b2,
               w3.astype(jnp.float32), b3c,
               w4.astype(jnp.float32), b4c,
               w5.astype(jnp.float32), b5c]

    # Lane-dense layout: batch on the lane axis, padded to a tile multiple.
    x_flat_t = x.reshape(B, H * W).astype(jnp.float32).T   # [16, B]
    b_pad = ((B + tb - 1) // tb) * tb
    x_flat_t = jnp.pad(x_flat_t, ((0, 0), (0, b_pad - B)))

    grid = (b_pad // tb,)

    def resident(arr):
        return pl.BlockSpec(arr.shape, lambda i: (0, 0))   # stays in VMEM

    out = pl.pallas_call(
        cnn1_kernel,
        out_shape=jax.ShapeDtypeStruct((1, b_pad), jnp.float32),
        grid=grid,
        in_specs=[pl.BlockSpec((H * W, tb), lambda i: (0, i))]
                 + [resident(wgt) for wgt in weights],
        out_specs=pl.BlockSpec((1, tb), lambda i: (0, i)),
        compiler_params=pltpu.CompilerParams(
            dimension_semantics=("parallel",)),
    )(x_flat_t, *weights)

    return out[:, :B].T                                    # [B, 1]


# --------------------------------------------------------------------------- #
# Param init (torch.nn defaults: U[-1/sqrt(fan_in), +1/sqrt(fan_in)]).
# --------------------------------------------------------------------------- #
def init_params(key):
    def uni(k, shape, fan_in):
        bound = 1.0 / float(np.sqrt(fan_in))
        return jax.random.uniform(k, shape, jnp.float32, -bound, bound)

    keys = jax.random.split(key, 10)
    c1w = uni(keys[0], (1, 1, 2, 2), 1 * 2 * 2)
    c1b = uni(keys[1], (1,), 1 * 2 * 2)
    c2w = uni(keys[2], (1, 1, 2, 2), 1 * 2 * 2)
    c2b = uni(keys[3], (1,), 1 * 2 * 2)
    w3 = uni(keys[4], (16, 36), 36); b3 = uni(keys[5], (16,), 36)
    w4 = uni(keys[6], (16, 16), 16); b4 = uni(keys[7], (16,), 16)
    w5 = uni(keys[8], (1, 16), 16);  b5 = uni(keys[9], (1,), 16)
    return (c1w, c1b, c2w, c2b, w3, b3, w4, b4, w5, b5)


# --------------------------------------------------------------------------- #
# Pure-JAX reference (real convolutions) matching the PyTorch forward.
# --------------------------------------------------------------------------- #
def reference_forward(x, params):
    (c1w, c1b, c2w, c2b, w3, b3, w4, b4, w5, b5) = params
    dn = ('NCHW', 'OIHW', 'NCHW')
    y = lax.conv_general_dilated(x, c1w, (1, 1), ((1, 1), (1, 1)),
                                 dimension_numbers=dn)
    y = jnp.maximum(y + c1b.reshape(1, -1, 1, 1), 0.0)
    y = lax.conv_general_dilated(y, c2w, (1, 1), ((1, 1), (1, 1)),
                                 dimension_numbers=dn)
    y = jnp.maximum(y + c2b.reshape(1, -1, 1, 1), 0.0)
    f = y.reshape(y.shape[0], -1)                          # [B, 36]
    h = jnp.maximum(f @ w3.T + b3, 0.0)
    h = jnp.maximum(h @ w4.T + b4, 0.0)
    return jax.nn.sigmoid(h @ w5.T + b5)                   # [B, 1]


if __name__ == "__main__":
    key = jax.random.PRNGKey(0)
    kx, kp = jax.random.split(key)

    # Input size implied by the module: Linear expects 1*6*6 after two
    # k=2/p=1/s=1 convs => spatial input is 4x4, single channel.
    B, C, H, W = 4, 1, 4, 4
    x = jax.random.normal(kx, (B, C, H, W), jnp.float32)
    params = init_params(kp)

    out = cnn1_forward(x, params)
    out = jax.block_until_ready(out)

    ref = reference_forward(x, params)
    assert out.shape == (B, 1)
    assert jnp.allclose(out, ref, atol=1e-5, rtol=1e-5), (out, ref)

    print("KERNEL_OK")
</pallas_src>

<mosaic_0001>
module attributes {stable_mosaic.version = 11 : i64} {
  func.func @cnn1_kernel(%arg0: i32, %arg1: memref<16x128xf32, #tpu.memory_space<vmem>>, %arg2: memref<25x16xf32, #tpu.memory_space<vmem>>, %arg3: memref<1x1xf32, #tpu.memory_space<vmem>>, %arg4: memref<36x25xf32, #tpu.memory_space<vmem>>, %arg5: memref<1x1xf32, #tpu.memory_space<vmem>>, %arg6: memref<16x36xf32, #tpu.memory_space<vmem>>, %arg7: memref<16x1xf32, #tpu.memory_space<vmem>>, %arg8: memref<16x16xf32, #tpu.memory_space<vmem>>, %arg9: memref<16x1xf32, #tpu.memory_space<vmem>>, %arg10: memref<1x16xf32, #tpu.memory_space<vmem>>, %arg11: memref<1x1xf32, #tpu.memory_space<vmem>>, %arg12: memref<1x128xf32, #tpu.memory_space<vmem>>) attributes {dimension_semantics = [#tpu.dimension_semantics<parallel>], iteration_bounds = array<i64: 1>, scalar_prefetch = 0 : i64, scratch_operands = 0 : i64, tpu.core_type = #tpu.core_type<tc>, window_params = [{transform_indices = @transform_0, window_bounds = array<i64: 16, 128>}, {pipeline_mode = #tpu.pipeline_mode<synchronous>, transform_indices = @transform_1, window_bounds = array<i64: 25, 16>}, {pipeline_mode = #tpu.pipeline_mode<synchronous>, transform_indices = @transform_2, window_bounds = array<i64: 1, 1>}, {pipeline_mode = #tpu.pipeline_mode<synchronous>, transform_indices = @transform_3, window_bounds = array<i64: 36, 25>}, {pipeline_mode = #tpu.pipeline_mode<synchronous>, transform_indices = @transform_4, window_bounds = array<i64: 1, 1>}, {pipeline_mode = #tpu.pipeline_mode<synchronous>, transform_indices = @transform_5, window_bounds = array<i64: 16, 36>}, {pipeline_mode = #tpu.pipeline_mode<synchronous>, transform_indices = @transform_6, window_bounds = array<i64: 16, 1>}, {pipeline_mode = #tpu.pipeline_mode<synchronous>, transform_indices = @transform_7, window_bounds = array<i64: 16, 16>}, {pipeline_mode = #tpu.pipeline_mode<synchronous>, transform_indices = @transform_8, window_bounds = array<i64: 16, 1>}, {pipeline_mode = #tpu.pipeline_mode<synchronous>, transform_indices = @transform_9, window_bounds = array<i64: 1, 16>}, {pipeline_mode = #tpu.pipeline_mode<synchronous>, transform_indices = @transform_10, window_bounds = array<i64: 1, 1>}, {transform_indices = @transform_11, window_bounds = array<i64: 1, 128>}]} {
    %c0 = arith.constant 0 : index
    %c0_0 = arith.constant 0 : index
    %0 = vector.load %arg1[%c0, %c0_0] : memref<16x128xf32, #tpu.memory_space<vmem>>, vector<16x128xf32>
    %c0_1 = arith.constant 0 : index
    %c0_2 = arith.constant 0 : index
    %1 = vector.load %arg2[%c0_1, %c0_2] : memref<25x16xf32, #tpu.memory_space<vmem>>, vector<25x16xf32>
    %cst = arith.constant dense<0.000000e+00> : vector<25x128xf32>
    %2 = tpu.matmul %1, %0, %cst {dimension_numbers = #tpu.dot_dimension_numbers<[1], [0], [0], [1], [0, 0, 1, 1], [], []>} : vector<25x16xf32>, vector<16x128xf32>, vector<25x128xf32> -> vector<25x128xf32>
    %c0_3 = arith.constant 0 : index
    %c0_4 = arith.constant 0 : index
    %3 = vector.load %arg3[%c0_3, %c0_4] : memref<1x1xf32, #tpu.memory_space<vmem>>, vector<1x1xf32>
    %4 = vector.broadcast %3 : vector<1x1xf32> to vector<25x128xf32>
    %5 = arith.addf %2, %4 : vector<25x128xf32>
    %cst_5 = arith.constant 0.000000e+00 : f32
    %6 = vector.broadcast %cst_5 : f32 to vector<25x128xf32>
    %7 = arith.maximumf %5, %6 : vector<25x128xf32>
    %c0_6 = arith.constant 0 : index
    %c0_7 = arith.constant 0 : index
    %8 = vector.load %arg4[%c0_6, %c0_7] : memref<36x25xf32, #tpu.memory_space<vmem>>, vector<36x25xf32>
    %cst_8 = arith.constant dense<0.000000e+00> : vector<36x128xf32>
    %9 = tpu.matmul %8, %7, %cst_8 {dimension_numbers = #tpu.dot_dimension_numbers<[1], [0], [0], [1], [0, 0, 1, 1], [], []>} : vector<36x25xf32>, vector<25x128xf32>, vector<36x128xf32> -> vector<36x128xf32>
    %c0_9 = arith.constant 0 : index
    %c0_10 = arith.constant 0 : index
    %10 = vector.load %arg5[%c0_9, %c0_10] : memref<1x1xf32, #tpu.memory_space<vmem>>, vector<1x1xf32>
    %11 = vector.broadcast %10 : vector<1x1xf32> to vector<36x128xf32>
    %12 = arith.addf %9, %11 : vector<36x128xf32>
    %cst_11 = arith.constant 0.000000e+00 : f32
    %13 = vector.broadcast %cst_11 : f32 to vector<36x128xf32>
    %14 = arith.maximumf %12, %13 : vector<36x128xf32>
    %c0_12 = arith.constant 0 : index
    %c0_13 = arith.constant 0 : index
    %15 = vector.load %arg6[%c0_12, %c0_13] : memref<16x36xf32, #tpu.memory_space<vmem>>, vector<16x36xf32>
    %cst_14 = arith.constant dense<0.000000e+00> : vector<16x128xf32>
    %16 = tpu.matmul %15, %14, %cst_14 {dimension_numbers = #tpu.dot_dimension_numbers<[1], [0], [0], [1], [0, 0, 1, 1], [], []>} : vector<16x36xf32>, vector<36x128xf32>, vector<16x128xf32> -> vector<16x128xf32>
    %c0_15 = arith.constant 0 : index
    %c0_16 = arith.constant 0 : index
    %17 = vector.load %arg7[%c0_15, %c0_16] : memref<16x1xf32, #tpu.memory_space<vmem>>, vector<16x1xf32>
    %18 = vector.broadcast %17 : vector<16x1xf32> to vector<16x128xf32>
    %19 = arith.addf %16, %18 : vector<16x128xf32>
    %cst_17 = arith.constant 0.000000e+00 : f32
    %20 = vector.broadcast %cst_17 : f32 to vector<16x128xf32>
    %21 = arith.maximumf %19, %20 : vector<16x128xf32>
    %c0_18 = arith.constant 0 : index
    %c0_19 = arith.constant 0 : index
    %22 = vector.load %arg8[%c0_18, %c0_19] : memref<16x16xf32, #tpu.memory_space<vmem>>, vector<16x16xf32>
    %cst_20 = arith.constant dense<0.000000e+00> : vector<16x128xf32>
    %23 = tpu.matmul %22, %21, %cst_20 {dimension_numbers = #tpu.dot_dimension_numbers<[1], [0], [0], [1], [0, 0, 1, 1], [], []>} : vector<16x16xf32>, vector<16x128xf32>, vector<16x128xf32> -> vector<16x128xf32>
    %c0_21 = arith.constant 0 : index
    %c0_22 = arith.constant 0 : index
    %24 = vector.load %arg9[%c0_21, %c0_22] : memref<16x1xf32, #tpu.memory_space<vmem>>, vector<16x1xf32>
    %25 = vector.broadcast %24 : vector<16x1xf32> to vector<16x128xf32>
    %26 = arith.addf %23, %25 : vector<16x128xf32>
    %cst_23 = arith.constant 0.000000e+00 : f32
    %27 = vector.broadcast %cst_23 : f32 to vector<16x128xf32>
    %28 = arith.maximumf %26, %27 : vector<16x128xf32>
    %c0_24 = arith.constant 0 : index
    %c0_25 = arith.constant 0 : index
    %29 = vector.load %arg10[%c0_24, %c0_25] : memref<1x16xf32, #tpu.memory_space<vmem>>, vector<1x16xf32>
    %cst_26 = arith.constant dense<0.000000e+00> : vector<1x128xf32>
    %30 = tpu.matmul %29, %28, %cst_26 {dimension_numbers = #tpu.dot_dimension_numbers<[1], [0], [0], [1], [0, 0, 1, 1], [], []>} : vector<1x16xf32>, vector<16x128xf32>, vector<1x128xf32> -> vector<1x128xf32>
    %c0_27 = arith.constant 0 : index
    %c0_28 = arith.constant 0 : index
    %31 = vector.load %arg11[%c0_27, %c0_28] : memref<1x1xf32, #tpu.memory_space<vmem>>, vector<1x1xf32>
    %32 = vector.broadcast %31 : vector<1x1xf32> to vector<1x128xf32>
    %33 = arith.addf %30, %32 : vector<1x128xf32>
    %cst_29 = arith.constant 0.000000e+00 : f32
    %34 = vector.broadcast %cst_29 : f32 to vector<1x128xf32>
    %35 = arith.subf %34, %33 : vector<1x128xf32>
    %36 = math.exp %35 : vector<1x128xf32>
    %cst_30 = arith.constant 1.000000e+00 : f32
    %37 = vector.broadcast %cst_30 : f32 to vector<1x128xf32>
    %38 = arith.addf %37, %36 : vector<1x128xf32>
    %cst_31 = arith.constant 1.000000e+00 : f32
    %39 = vector.broadcast %cst_31 : f32 to vector<1x128xf32>
    %40 = arith.divf %39, %38 : vector<1x128xf32>
    %c0_32 = arith.constant 0 : index
    %c0_33 = arith.constant 0 : index
    %41 = vector.load %arg12[%c0_32, %c0_33] : memref<1x128xf32, #tpu.memory_space<vmem>>, vector<1x128xf32>
    tpu.vector_store %arg12[%c0_32, %c0_33], %40 {strides = array<i32>} : memref<1x128xf32, #tpu.memory_space<vmem>>, vector<1x128xf32>,
    return
  }
  func.func @transform_0(%arg0: i32) -> (i32, i32) {
    %c0_i32 = arith.constant 0 : i32
    %c0_i32_0 = arith.constant 0 : i32
    return %c0_i32, %arg0 : i32, i32
  }
  func.func @transform_1(%arg0: i32) -> (i32, i32) {
    %c0_i32 = arith.constant 0 : i32
    %c0_i32_0 = arith.constant 0 : i32
    %c0_i32_1 = arith.constant 0 : i32
    return %c0_i32, %c0_i32_0 : i32, i32
  }
  func.func @transform_2(%arg0: i32) -> (i32, i32) {
    %c0_i32 = arith.constant 0 : i32
    %c0_i32_0 = arith.constant 0 : i32
    %c0_i32_1 = arith.constant 0 : i32
    return %c0_i32, %c0_i32_0 : i32, i32
  }
  func.func @transform_3(%arg0: i32) -> (i32, i32) {
    %c0_i32 = arith.constant 0 : i32
    %c0_i32_0 = arith.constant 0 : i32
    %c0_i32_1 = arith.constant 0 : i32
    return %c0_i32, %c0_i32_0 : i32, i32
  }
  func.func @transform_4(%arg0: i32) -> (i32, i32) {
    %c0_i32 = arith.constant 0 : i32
    %c0_i32_0 = arith.constant 0 : i32
    %c0_i32_1 = arith.constant 0 : i32
    return %c0_i32, %c0_i32_0 : i32, i32
  }
  func.func @transform_5(%arg0: i32) -> (i32, i32) {
    %c0_i32 = arith.constant 0 : i32
    %c0_i32_0 = arith.constant 0 : i32
    %c0_i32_1 = arith.constant 0 : i32
    return %c0_i32, %c0_i32_0 : i32, i32
  }
  func.func @transform_6(%arg0: i32) -> (i32, i32) {
    %c0_i32 = arith.constant 0 : i32
    %c0_i32_0 = arith.constant 0 : i32
    %c0_i32_1 = arith.constant 0 : i32
    return %c0_i32, %c0_i32_0 : i32, i32
  }
  func.func @transform_7(%arg0: i32) -> (i32, i32) {
    %c0_i32 = arith.constant 0 : i32
    %c0_i32_0 = arith.constant 0 : i32
    %c0_i32_1 = arith.constant 0 : i32
    return %c0_i32, %c0_i32_0 : i32, i32
  }
  func.func @transform_8(%arg0: i32) -> (i32, i32) {
    %c0_i32 = arith.constant 0 : i32
    %c0_i32_0 = arith.constant 0 : i32
    %c0_i32_1 = arith.constant 0 : i32
    return %c0_i32, %c0_i32_0 : i32, i32
  }
  func.func @transform_9(%arg0: i32) -> (i32, i32) {
    %c0_i32 = arith.constant 0 : i32
    %c0_i32_0 = arith.constant 0 : i32
    %c0_i32_1 = arith.constant 0 : i32
    return %c0_i32, %c0_i32_0 : i32, i32
  }
  func.func @transform_10(%arg0: i32) -> (i32, i32) {
    %c0_i32 = arith.constant 0 : i32
    %c0_i32_0 = arith.constant 0 : i32
    %c0_i32_1 = arith.constant 0 : i32
    return %c0_i32, %c0_i32_0 : i32, i32
  }
  func.func @transform_11(%arg0: i32) -> (i32, i32) {
    %c0_i32 = arith.constant 0 : i32
    %c0_i32_0 = arith.constant 0 : i32
    return %c0_i32, %arg0 : i32, i32
  }
}

</mosaic_0001>

<bundles_post_ra>
// kernel: tpu_custom_call.1
= control target key start
LH: loop header
LB: loop body
LE: loop exit
PB: predicated region body
PF: predicated region fallthrough
CT: control target
= control target key end

     0   :  { %s937_s0 = inlined_call_operand.vmem [shape: f32[16,128], index: 0, kind: input, shape index: {}]   ;;  %s938_s1 = inlined_call_operand.vmem [shape: f32[25,16], index: 1, kind: input, shape index: {}]   ;;  %s939_s2 = inlined_call_operand.<no memory space> [shape: f32[1,1], index: 2, kind: input, shape index: {}]   ;;  %s940_s3 = inlined_call_operand.vmem [shape: f32[36,25], index: 3, kind: input, shape index: {}]   ;;  %s941_s5 = inlined_call_operand.vmem [shape: f32[16,36], index: 5, kind: input, shape index: {}]   ;;  %s942_s6 = inlined_call_operand.vmem [shape: f32[16,1], index: 6, kind: input, shape index: {}]   ;;  %s943_s7 = inlined_call_operand.vmem [shape: f32[16,16], index: 7, kind: input, shape index: {}]   ;;  %s944_s8 = inlined_call_operand.vmem [shape: f32[16,1], index: 8, kind: input, shape index: {}]   ;;  %s945_s9 = inlined_call_operand.vmem [shape: f32[1,16], index: 9, kind: input, shape index: {}]   ;;  %s946_s11 = inlined_call_operand.hbm [shape: f32[1,128], index: 11, kind: output, shape index: {}]   ;;  %s947_s4 = inlined_call_operand.<no memory space> [shape: f32[1,1], index: 4, kind: input, shape index: {}]   ;;  %s948_s10 = inlined_call_operand.<no memory space> [shape: f32[1,1], index: 10, kind: input, shape index: {}]  }
   0x1   :  { %v16_v0 = vstv %s939_s2  ;;  %v18_v1 = vstv %s947_s4  ;;  %v20_v2 = vstv %s948_s10 }
   0x2   :  { %17 = vst [vmem:[#allocation2] sm:$0x1] %v16_v0  ;;  %19 = vst [vmem:[#allocation3] sm:$0x1] %v18_v1 }
   0x3   :  { %21 = vst [vmem:[#allocation4] sm:$0x1] %v20_v2 }
   0x4   :  { %v45_v3 = vld [vmem:[%s937_s0] sm:$0xff]  ;;  %v46_v4 = vld [vmem:[%s937_s0 + $0x8] sm:$0xff]  ;;  %vm61_vm0 = vcmask 130048   ;;  %v766_v7 = vmov 0  }
   0x5   :  { %v47_v5 = vld [vmem:[%s938_s1] sm:$0xff]  ;;  %v704_v6 = vpack.c.bf16 %v46_v4, %v45_v3  ;;  %736 = vset.pattern.permute.xlu0 %v766_v7  ;;  %737 = vset.pattern.permute.xlu1 %v766_v7 }
   0x6   :  { %648 = vmatprep.mubr.msk.f32.mxu0 %vm61_vm0, %v47_v5 }
   0x7   :  { %705 = vmatprep.subr.bf16.mxu0 %v704_v6 }
   0x9   :  { %v597_v8 = vld [vmem:[#allocation2] ss:$0 sm:$0xff] }
   0xa   :  { %58 = vperm.xlu0 %736, %v597_v8  }
   0xb   :  { %22 = vsyncpa [#allocation6], 0  ;;  %707 = vmatpush3.bf16.msra.mxu0 %v704_v6  ;;  %v48_v9 = vld [vmem:[%s938_s1 + $0x8] sm:$0xff]  ;;  %v602_v10 = vld [vmem:[#allocation3] ss:$0 sm:$0xff]  ;;  %v767_v15 = vmov 0.0|0.0  }
   0xc   :  { %v49_v11 = vld [vmem:[%s938_s1 + $0x10] sm:$0xff]  ;;  %v50_v12 = vld [vmem:[%s938_s1 + $0x18] sm:$0x1]  ;;  %v397_v13 = vld [vmem:[%s944_s8] sm:$0xff]  ;;  %708 = vmatprep.subr.bf16.mxu1 %v767_v15  ;;  %vm768_vm1 = vmmov 0   ;;  %v769_v16 = vmov 0.0  }
   0xd   :  { %v493_v14 = vld [vmem:[#allocation4] sm:$0x1]  ;;  %662 = vmatprep.mubr.msk.f32.mxu1 %vm768_vm1, %v769_v16  ;;  %vm194_vm2 = vcmask 1040384   ;;  %vm770_vm3 = vmmov 1   ;;  %vm178_vm5 = vcmask 203776   ;;  %v164_v33 = vld [vmem:[%s940_s3 + $0x8] sm:$0xff] }
   0xe   :  { %649 = vmatmul.mubr.msk.f32.vlgmr.msra.gmra.mrb[0].mxu0 %vm61_vm0, %v48_v9  ;;  %175 = vperm.xlu0 %736, %v602_v10   ;;  %vm713_vm4 = vmpackc.low %vm194_vm2, %vm770_vm3  ;;  %v163_v32 = vld [vmem:[%s940_s3] sm:$0xff]  ;;  %v165_v34 = vld [vmem:[%s940_s3 + $0x10] sm:$0xff]  ;;  %vm307_vm6 = vcmask 293888   ;;  %vm314_vm7 = vcmask 1043456  }
   0xf   :  { %651 = vmatprep.mubr.msk.f32.mxu0 %vm61_vm0, %v49_v11  ;;  %v166_v35 = vld [vmem:[%s940_s3 + $0x18] sm:$0xff]  ;;  %v167_v36 = vld [vmem:[%s940_s3 + $0x20] sm:$0xf]  ;;  %v296_v39 = vld [vmem:[%s942_s6 + $0x8] sm:$0xff] }
  0x10   :  { %v293_v37 = vld [vmem:[%s941_s5] sm:$0xff]  ;;  %v398_v40 = vld [vmem:[%s944_s8 + $0x8] sm:$0xff] }
  0x11   :  { %v295_v38 = vld [vmem:[%s942_s6] sm:$0xff]  ;;  %v294_v0 = vld [vmem:[%s941_s5 + $0x8] sm:$0xff] }
  0x12   :  { %652 = vmatmul.mubr.msk.f32.gmra.mrb[2].mxu0 %vm61_vm0, %v50_v12  ;;  %401 = vperm.xlu0 %736, %v397_v13   ;;  %v395_v1 = vld [vmem:[%s943_s7] sm:$0xff]  ;;  %v396_v11 = vld [vmem:[%s943_s7 + $0x8] sm:$0xff]  ;;  %s771_s7 = smov [#allocation5]  }
  0x13   :  { %687 = vmatprep.mubr.msk.f32.mxu0 %vm307_vm6, %v293_v37  ;;  %299 = vperm.xlu1 %737, %v295_v38   ;;  %s589_s12 = sshll.u32 %s771_s7, 4  ;;  %s590_s12 = int_to_ptr.vmem [resolvable:$true] %s589_s12 }
  0x14   :  { %s746_s13 = scalar_lea.vmem %s590_s12, 32  ;;  %p747_p1 = scmp.lt.s32.totalorder %s590_s12, %s590_s12 }
  0x16   :  { %496 = vperm.xlu0 %736, %v493_v14  }
  0x17   :  { %304 = vperm.xlu1 %737, %v296_v39  }
  0x1b   :  { %406 = vperm.xlu1 %737, %v398_v40  }
  0x89   :  { %v59_v17 = vpop.permute.xlu0 %58 }
  0x8d   :  { %v176_v43 = vpop.permute.xlu0 %175 }
  0x91   :  { %v402_v14 = vpop.permute.xlu0 %401 }
  0x92   :  { %v300_v2 = vpop.permute.xlu1 %299 }
  0x96   :  { %v305_v3 = vpop.permute.xlu1 %304 }
  0x9a   :  { %v407_v12 = vpop.permute.xlu1 %406 }
  0xe1   :  { %v650_v18 = vpop.f32.mrb[0].mxu0 }
  0xe2   :  { %v146_v19 = vadd.f32 %v650_v18, %v59_v17  ;;  %v140_v20 = vpop.f32.mrb[1].mxu0 }
  0xe3   :  { %v141_v21 = vadd.f32 %v140_v20, %v59_v17 }
  0xe4   :  { %v160_v22 = vmax.f32 %v146_v19, 0.0 }
  0xe5   :  { %v159_v23 = vmax.f32 %v141_v21, 0.0  ;;  %v653_v24 = vpop.f32.mrb[2].mxu0 }
  0xe6   :  { %v156_v25 = vadd.f32 %v653_v24, %v59_v17  ;;  %v150_v26 = vpop.f32.mrb[3].mxu0 }
  0xe7   :  { %v151_v27 = vadd.f32 %v150_v26, %v59_v17  ;;  %v709_v28 = vpack.c.bf16 %v160_v22, %v159_v23  ;;  %v492_v23 = vld [vmem:[%s945_s9] sm:$0x1]  ;;  %s742_s9 = scalar_lea.vmem %s590_s12, 16 }
  0xe8   :  { %v162_v29 = vmax.f32 %v156_v25, 0.0  ;;  %p743_p0 = scmp.ne.s32.totalorder %s590_s12, %s742_s9  ;;  %p748_p2 = scmp.lt.s32.totalorder %s746_s13, %s742_s9 }
  0xe9   :  { %v161_v30 = vmax.f32 %v151_v27, 0.0  ;;  %710 = vmatpush3.bf16.msra.mxu1 %v709_v28 }
  0xea   :  { %711 = vmatprep.subr.bf16.mxu1 %v767_v15  ;;  %p749_p3 = por %p748_p2, %p747_p1 }
  0xeb   :  { %v712_v31 = vpack.c.bf16 %v162_v29, %v161_v30 }
  0xec   :  { %p750_p4 = pnand %p749_p3, %p743_p0 }
  0xed   :  { %714 = vmatpush3.bf16.msk.msra.mxu1 %vm713_vm4, %v712_v31 }
  0xf0   :  { %663 = vmatmul.mubr.msk.f32.vlgmr.msra.gmra.mrb[0].mxu1 %vm178_vm5, %v163_v32 }
  0xf1   :  { %665 = vmatprep.mubr.msk.f32.mxu1 %vm768_vm1, %v769_v16 }
  0xf4   :  { %666 = vmatmul.mubr.msk.f32.gmra.mrb[2].mxu1 %vm178_vm5, %v164_v33 }
  0xf5   :  { %668 = vmatprep.mubr.msk.f32.mxu1 %vm768_vm1, %v769_v16 }
  0xf8   :  { %669 = vmatmul.mubr.msk.f32.gmra.mrb[4].mxu1 %vm178_vm5, %v165_v34 }
  0xf9   :  { %671 = vmatprep.mubr.msk.f32.mxu1 %vm768_vm1, %v769_v16 }
  0xfc   :  { %672 = vmatmul.mubr.msk.f32.gmra.mrb[6].mxu1 %vm178_vm5, %v166_v35 }
  0xfd   :  { %674 = vmatprep.mubr.msk.f32.mxu1 %vm768_vm1, %v769_v16 }
 0x100   :  { %675 = vmatmul.mubr.msk.f32.gmra.mrb[8].mxu1 %vm178_vm5, %v167_v36 }
 0x1c3   :  { %v264_v41 = vpop.f32.mrb[0].mxu1 }
 0x1c4   :  { %v664_v42 = vpop.f32.mrb[1].mxu1  ;;  %v265_v44 = vadd.f32 %v264_v41, %v176_v43 }
 0x1c6   :  { %v288_v48 = vmax.f32 %v265_v44, 0.0 }
 0x1c7   :  { %v269_v45 = vpop.f32.mrb[2].mxu1 }
 0x1c8   :  { %v270_v46 = vadd.f32 %v269_v45, %v176_v43  ;;  %v667_v47 = vpop.f32.mrb[3].mxu1 }
 0x1ca   :  { %v289_v49 = vmax.f32 %v270_v46, 0.0 }
 0x1cb   :  { %v274_v50 = vpop.f32.mrb[4].mxu1 }
 0x1cc   :  { %v715_v51 = vpack.c.bf16 %v289_v49, %v288_v48  ;;  %v670_v52 = vpop.f32.mrb[5].mxu1  ;;  %v275_v53 = vadd.f32 %v274_v50, %v176_v43 }
 0x1ce   :  { %716 = vmatprep.subr.bf16.mxu0 %v715_v51  ;;  %v290_v57 = vmax.f32 %v275_v53, 0.0 }
 0x1cf   :  { %v279_v54 = vpop.f32.mrb[6].mxu1  ;;  %718 = vmatpush3.bf16.msra.mxu0 %v715_v51 }
 0x1d0   :  { %v280_v55 = vadd.f32 %v279_v54, %v176_v43  ;;  %v673_v56 = vpop.f32.mrb[7].mxu1 }
 0x1d2   :  { %v291_v58 = vmax.f32 %v280_v55, 0.0 }
 0x1d3   :  { %v284_v59 = vpop.f32.mrb[8].mxu1 }
 0x1d4   :  { %v719_v60 = vpack.c.bf16 %v291_v58, %v290_v57  ;;  %v285_v61 = vadd.f32 %v284_v59, %v176_v43  ;;  %v676_v62 = vpop.f32.mrb[9].mxu1 }
 0x1d6   :  { %v292_v63 = vmax.f32 %v285_v61, 0.0  ;;  %720 = vmatprep.subr.bf16.mxu0 %v719_v60 }
 0x1d7   :  { %722 = vmatpush3.bf16.msra.mxu0 %v719_v60 }
 0x1d8   :  { %685 = vmatprep.subr.msk.mxu0 %vm314_vm7, %v292_v63 }
 0x1db   :  { %686 = vmatpush3.msk.msra.mxu0 %vm314_vm7, %v292_v63 }
 0x1dc   :  { %688 = vmatmul.mubr.msk.f32.vlgmr.msra.gmra.mrb[4].mxu0 %vm307_vm6, %v294_v0 }
 0x1dd   :  { %694 = vmatprep.mubr.msk.f32.mxu0 %vm61_vm0, %v395_v1 }
 0x2af   :  { %v689_v4 = vpop.f32.mrb[4].mxu0 }
 0x2b0   :  { %v390_v5 = vadd.f32 %v689_v4, %v305_v3  ;;  %v384_v6 = vpop.f32.mrb[5].mxu0 }
 0x2b1   :  { %v385_v7 = vadd.f32 %v384_v6, %v300_v2 }
 0x2b2   :  { %v394_v8 = vmax.f32 %v390_v5, 0.0 }
 0x2b3   :  { %v393_v9 = vmax.f32 %v385_v7, 0.0 }
 0x2b5   :  { %v723_v10 = vpack.c.bf16 %v394_v8, %v393_v9 }
 0x2b7   :  { %724 = vmatprep.subr.bf16.mxu0 %v723_v10 }
 0x2b8   :  { %726 = vmatpush3.bf16.msra.mxu0 %v723_v10 }
 0x2b9   :  { %727 = vmatprep.subr.bf16.mxu0 %v767_v15  ;;  %v499_v15 = vlaneseq }
 0x2bb   :  { %695 = vmatmul.mubr.msk.f32.vlgmr.msra.gmra.mrb[6].mxu0 %vm61_vm0, %v396_v11  ;;  %v500_v24 = vshrl.u32 %v499_v15, 7 }
 0x2bc   :  { %701 = vmatprep.mubr.msk.f32.mxu0 %vm768_vm1, %v769_v16  ;;  %v497_v16 = vpop.permute.xlu0 %496 }
 0x2bd   :  { %v501_v25 = vsub.s32 0, %v500_v24 }
 0x2bf   :  { %v502_v26 = vrot.slane %v497_v16, %v501_v25 }
 0x38e   :  { %v696_v13 = vpop.f32.mrb[6].mxu0 }
 0x38f   :  { %v487_v17 = vadd.f32 %v696_v13, %v407_v12  ;;  %v481_v18 = vpop.f32.mrb[7].mxu0 }
 0x390   :  { %v482_v19 = vadd.f32 %v481_v18, %v402_v14 }
 0x391   :  { %v491_v20 = vmax.f32 %v487_v17, 0.0 }
 0x392   :  { %v490_v21 = vmax.f32 %v482_v19, 0.0 }
 0x394   :  { %v728_v22 = vpack.c.bf16 %v491_v20, %v490_v21 }
 0x396   :  { %729 = vmatpush3.bf16.msra.mxu0 %v728_v22 }
 0x399   :  { %702 = vmatmul.mubr.msk.f32.vlgmr.msra.gmra.mrb[8].mxu0 %vm61_vm0, %v492_v23 }
 0x46c   :  { %v572_v27 = vpop.f32.mrb[8].mxu0 }
 0x46d   :  { %v573_v28 = vadd.f32 %v572_v27, %v502_v26  ;;  %v703_v29 = vpop.f32.mrb[9].mxu0 }
 0x46f   :  { %v576_v30 = vsub.f32 0.0, %v573_v28 }
 0x471   :  { %v577_v31 = vmul.f32 1.442695, %v576_v30 }
 0x473   :  { %738 = vpow2.f32 %v577_v31 }
 0x47d   :  { %v739_v32 = vpop.eup %738 }
 0x47e   :  { %v579_v33 = vadd.f32 1.0, %v739_v32 }
 0x480   :  { %740 = vrcp.f32 %v579_v33 }
 0x48a   :  { %v741_v34 = vpop.eup %740 }
 0x48b   :  { %582 = vst [vmem:[#allocation5] sm:$0x1] %v741_v34 }
 0x48c   :  { %753 = shalt.err (!%p750_p4)
}
 0x48d   :  { %s754_s15 = scalar_lea.hbm %s946_s11, 16 }
 0x48e   :  { %p755_p5 = scmp.ne.s32.totalorder %s946_s11, %s754_s15  ;;  %p758_p6 = scmp.lt.u32.totalorder %s754_s15, %s946_s11 }
 0x490   :  { %p760_p7 = pnand %p758_p6, %p755_p5 }
 0x492   :  { %763 = shalt.err (!%p760_p7)
}
 0x493   :  { %592 = dma.vmem_to_hbm [thread:$0]  %s590_s12, 16, %s946_s11, [#allocation6]  }
 0x494   :  { %764 = dma.done.wait [#allocation6], 16  }
 0x495   :  { %765 = vsyncadd [#allocation6], 4294967280 }
 0x496   :  { %596 = vsyncpa [#allocation6], 1 }

</bundles_post_ra>
